<compile_context>
chip_gen: v7x
topology: tpu7x:2x2x1
jax: 0.10.0
libtpu: 0.0.40
codegen_flags: <defaults>
</compile_context>

<pallas_src>
import functools
import math

import jax
import jax.numpy as jnp
from jax.experimental import pallas as pl
from jax.experimental.pallas import tpu as pltpu


# ---------------------------------------------------------------------------
# Kernel: one (TB, C_out) output tile, accumulated over the K (feature) axis.
# ---------------------------------------------------------------------------
def _linear_kernel(x_ref, w_ref, b_ref, o_ref, acc_ref):
    # x_ref : (TB, TK)      activation tile
    # w_ref : (TK, C_out)   weight tile, (D, C) layout -> canonical MXU dot
    # b_ref : (1,  C_out)   bias (f32), resident across the whole grid
    # o_ref : (TB, C_out)   output tile (resident across the K axis)
    # acc_ref: (TB, C_out)  f32 accumulator scratch
    k = pl.program_id(1)

    @pl.when(k == 0)
    def _():
        acc_ref[...] = jnp.zeros_like(acc_ref)

    acc_ref[...] += jnp.dot(
        x_ref[...], w_ref[...], preferred_element_type=jnp.float32
    )

    @pl.when(k == pl.num_programs(1) - 1)
    def _():
        o_ref[...] = (acc_ref[...] + b_ref[...]).astype(o_ref.dtype)


# ---------------------------------------------------------------------------
# VMEM-aware tiling.
# ---------------------------------------------------------------------------
_VMEM_BUDGET = 40 * 1024 * 1024       # fits inside v7x's 64 MiB physical VMEM
_MIN_VMEM_LIMIT = 32 * 1024 * 1024
_MAX_VMEM_LIMIT = 56 * 1024 * 1024


def _round_up(x: int, m: int) -> int:
    return ((x + m - 1) // m) * m


def _footprint_bytes(tb, tk, c_out, x_item, w_item, out_item):
    c_lanes = max(_round_up(c_out, 128), 128)
    tk_lanes = max(_round_up(tk, 128), 128)
    x_bytes = 2 * tb * tk_lanes * x_item                 # double-buffered x
    w_bytes = 2 * _round_up(tk, 8) * c_lanes * w_item    # double-buffered W
    o_bytes = 2 * tb * c_lanes * out_item                # double-buffered out
    acc_bytes = tb * c_lanes * 4                         # f32 accumulator
    b_bytes = 2 * 8 * c_lanes * 4                        # bias (tiny)
    return x_bytes + w_bytes + o_bytes + acc_bytes + b_bytes


def _pick_tiles(B, D, c_out, x_item, w_item, out_item):
    # Batch-tile candidates, largest first; small batches use the whole batch.
    if B <= 128:
        tb_candidates = [B]
    else:
        tb_candidates = [t for t in (1024, 512, 256, 128) if t <= B]
    # K-tile candidates: whole D first, then 128-multiples that divide D.
    # Ragged K tiles would feed garbage into the accumulation, so require
    # divisibility; otherwise keep K monolithic.
    tk_candidates = [D] + [t for t in (4096, 2048, 1024, 512, 256, 128)
                           if t < D and D % t == 0]

    for tb in tb_candidates:
        for tk in tk_candidates:
            if _footprint_bytes(tb, tk, c_out, x_item, w_item, out_item) <= _VMEM_BUDGET:
                # v7x megacore: avoid a one-step batch grid for medium/large
                # batches so both TensorCores get work.
                if tb >= B and B >= 256:
                    tb = _round_up(pl.cdiv(B, 2), 8)
                return tb, tk
    # TODO(synk): for very large D with no 128-multiple divisor the K axis is
    # left monolithic; pad D at init if this ever exceeds the VMEM budget.
    return tb_candidates[-1], tk_candidates[-1]


# ---------------------------------------------------------------------------
# Jitted forward (tile selection happens at trace time from static shapes).
# ---------------------------------------------------------------------------
def _forward_impl(x, w_t, b2, *, compute_dtype):
    out_dtype = x.dtype
    if compute_dtype is not None and x.dtype != compute_dtype:
        x = x.astype(compute_dtype)

    B, D = x.shape
    c_out = w_t.shape[1]

    tb, tk = _pick_tiles(
        B, D, c_out,
        x.dtype.itemsize, w_t.dtype.itemsize, jnp.dtype(out_dtype).itemsize,
    )
    nb = pl.cdiv(B, tb)
    nk = pl.cdiv(D, tk)

    vmem_need = _footprint_bytes(
        tb, tk, c_out,
        x.dtype.itemsize, w_t.dtype.itemsize, jnp.dtype(out_dtype).itemsize,
    )
    vmem_limit = int(min(max(2 * vmem_need, _MIN_VMEM_LIMIT), _MAX_VMEM_LIMIT))

    return pl.pallas_call(
        _linear_kernel,
        out_shape=jax.ShapeDtypeStruct((B, c_out), out_dtype),
        grid=(nb, nk),
        in_specs=[
            pl.BlockSpec((tb, tk), lambda i, k: (i, k)),      # x: batch x K tiles
            pl.BlockSpec((tk, c_out), lambda i, k: (k, 0)),   # W: K tiles, resident in C
            pl.BlockSpec((1, c_out), lambda i, k: (0, 0)),    # b: resident
        ],
        out_specs=pl.BlockSpec((tb, c_out), lambda i, k: (i, 0)),
        scratch_shapes=[pltpu.VMEM((tb, c_out), jnp.float32)],
        compiler_params=pltpu.CompilerParams(
            # batch steps independent -> megacore; K is the reduction axis.
            dimension_semantics=("parallel", "arbitrary"),
            vmem_limit_bytes=vmem_limit,
        ),
    )(x, w_t, b2)


# ---------------------------------------------------------------------------
# Module wrapper: parameters prepped ONCE and cached.
# ---------------------------------------------------------------------------
class SimpleClassifierPallas:
    """Pallas-TPU forward for SimpleClassifier (nn.Linear(input_size, num_classes))."""

    def __init__(self, weight, bias, *, use_bf16_inputs: bool = False,
                 pad_classes=None):
        # weight: (C, D) in PyTorch nn.Linear layout; bias: (C,)
        C, D = weight.shape
        self.num_classes = C
        self.input_size = D

        # Pad classes up to a lane multiple only when the inflation is modest;
        # for tiny heads (e.g. C=4) a masked (B, C) store is cheaper than a
        # 32x-wider padded store plus a trailing slice pass.
        if pad_classes is None:
            pad_classes = (C % 128 != 0) and (C >= 64)
        c_out = _round_up(C, 128) if pad_classes else C
        self._c_out = c_out
        self._needs_slice = c_out != C

        param_dtype = jnp.bfloat16 if use_bf16_inputs else jnp.asarray(weight).dtype
        w_t = jnp.asarray(weight, dtype=param_dtype).T          # (D, C) once, cached
        b2 = jnp.asarray(bias, jnp.float32).reshape(1, C)
        if c_out != C:
            w_t = jnp.pad(w_t, ((0, 0), (0, c_out - C)))
            b2 = jnp.pad(b2, ((0, 0), (0, c_out - C)))

        self.w_t = jax.block_until_ready(w_t)
        self.b2 = jax.block_until_ready(b2)
        self._compute_dtype = jnp.bfloat16 if use_bf16_inputs else None

        self._forward = jax.jit(
            functools.partial(_forward_impl, compute_dtype=self._compute_dtype)
        )

    def __call__(self, x):
        y = self._forward(x, self.w_t, self.b2)
        if self._needs_slice:
            # Consumers that accept the lane-padded (B, c_out) output should use
            # self._forward directly and skip this slice.
            y = y[:, : self.num_classes]
        return y


if __name__ == "__main__":
    # Small shapes consistent with the module: bag-of-words feature vector of
    # size 32 mapped to 4 classes.
    batch, input_size, num_classes = 8, 32, 4

    key = jax.random.PRNGKey(0)
    kx, kw, kb = jax.random.split(key, 3)

    # Deterministic init mimicking nn.Linear's default U(-1/sqrt(D), 1/sqrt(D)).
    bound = 1.0 / math.sqrt(input_size)
    weight = jax.random.uniform(
        kw, (num_classes, input_size), jnp.float32, -bound, bound
    )
    bias = jax.random.uniform(kb, (num_classes,), jnp.float32, -bound, bound)
    x = jax.random.normal(kx, (batch, input_size), jnp.float32)

    model = SimpleClassifierPallas(weight, bias)   # exact-f32 path
    y = jax.block_until_ready(model(x))

    # Reference: plain-JAX nn.Linear math.
    y_ref = x @ weight.T + bias
    assert y.shape == (batch, num_classes)
    assert jnp.allclose(y, y_ref, atol=1e-5, rtol=1e-5)

    print("KERNEL_OK")
</pallas_src>

<mosaic_0001>
module attributes {stable_mosaic.version = 11 : i64} {
  func.func @_linear_kernel(%arg0: i32, %arg1: i32, %arg2: memref<8x32xf32, #tpu.memory_space<vmem>>, %arg3: memref<32x4xf32, #tpu.memory_space<vmem>>, %arg4: memref<1x4xf32, #tpu.memory_space<vmem>>, %arg5: memref<8x4xf32, #tpu.memory_space<vmem>>, %arg6: memref<8x4xf32, #tpu.memory_space<vmem>>) attributes {dimension_semantics = [#tpu.dimension_semantics<parallel>, #tpu.dimension_semantics<arbitrary>], iteration_bounds = array<i64: 1, 1>, scalar_prefetch = 0 : i64, scratch_operands = 1 : i64, tpu.core_type = #tpu.core_type<tc>, window_params = [{transform_indices = @transform_0, window_bounds = array<i64: 8, 32>}, {transform_indices = @transform_1, window_bounds = array<i64: 32, 4>}, {pipeline_mode = #tpu.pipeline_mode<synchronous>, transform_indices = @transform_2, window_bounds = array<i64: 1, 4>}, {transform_indices = @transform_3, window_bounds = array<i64: 8, 4>}]} {
    %c0_i32 = arith.constant 0 : i32
    %0 = arith.cmpi eq, %arg1, %c0_i32 : i32
    %1 = arith.extui %0 : i1 to i32
    %c0_i32_0 = arith.constant 0 : i32
    %2 = arith.cmpi ne, %1, %c0_i32_0 : i32
    scf.if %2 {
      %cst_10 = arith.constant 0.000000e+00 : f32
      %12 = vector.broadcast %cst_10 : f32 to vector<8x4xf32>
      %c0_11 = arith.constant 0 : index
      %c0_12 = arith.constant 0 : index
      %13 = vector.load %arg6[%c0_11, %c0_12] : memref<8x4xf32, #tpu.memory_space<vmem>>, vector<8x4xf32>
      tpu.vector_store %arg6[%c0_11, %c0_12], %12 {strides = array<i32>} : memref<8x4xf32, #tpu.memory_space<vmem>>, vector<8x4xf32>,
    } else {
    }
    %c0 = arith.constant 0 : index
    %c0_1 = arith.constant 0 : index
    %3 = vector.load %arg6[%c0, %c0_1] : memref<8x4xf32, #tpu.memory_space<vmem>>, vector<8x4xf32>
    %c0_2 = arith.constant 0 : index
    %c0_3 = arith.constant 0 : index
    %4 = vector.load %arg2[%c0_2, %c0_3] : memref<8x32xf32, #tpu.memory_space<vmem>>, vector<8x32xf32>
    %c0_4 = arith.constant 0 : index
    %c0_5 = arith.constant 0 : index
    %5 = vector.load %arg3[%c0_4, %c0_5] : memref<32x4xf32, #tpu.memory_space<vmem>>, vector<32x4xf32>
    %cst = arith.constant dense<0.000000e+00> : vector<8x4xf32>
    %6 = tpu.matmul %4, %5, %cst {dimension_numbers = #tpu.dot_dimension_numbers<[1], [0], [0], [1], [0, 0, 1, 1], [], []>} : vector<8x32xf32>, vector<32x4xf32>, vector<8x4xf32> -> vector<8x4xf32>
    %7 = arith.addf %3, %6 : vector<8x4xf32>
    %c0_6 = arith.constant 0 : index
    %c0_7 = arith.constant 0 : index
    %8 = vector.load %arg6[%c0_6, %c0_7] : memref<8x4xf32, #tpu.memory_space<vmem>>, vector<8x4xf32>
    tpu.vector_store %arg6[%c0_6, %c0_7], %7 {strides = array<i32>} : memref<8x4xf32, #tpu.memory_space<vmem>>, vector<8x4xf32>,
    %c0_i32_8 = arith.constant 0 : i32
    %9 = arith.cmpi eq, %arg1, %c0_i32_8 : i32
    %10 = arith.extui %9 : i1 to i32
    %c0_i32_9 = arith.constant 0 : i32
    %11 = arith.cmpi ne, %10, %c0_i32_9 : i32
    scf.if %11 {
      %c0_10 = arith.constant 0 : index
      %c0_11 = arith.constant 0 : index
      %12 = vector.load %arg6[%c0_10, %c0_11] : memref<8x4xf32, #tpu.memory_space<vmem>>, vector<8x4xf32>
      %c0_12 = arith.constant 0 : index
      %c0_13 = arith.constant 0 : index
      %13 = vector.load %arg4[%c0_12, %c0_13] : memref<1x4xf32, #tpu.memory_space<vmem>>, vector<1x4xf32>
      %14 = vector.broadcast %13 : vector<1x4xf32> to vector<8x4xf32>
      %15 = arith.addf %12, %14 : vector<8x4xf32>
      %c0_14 = arith.constant 0 : index
      %c0_15 = arith.constant 0 : index
      %16 = vector.load %arg5[%c0_14, %c0_15] : memref<8x4xf32, #tpu.memory_space<vmem>>, vector<8x4xf32>
      tpu.vector_store %arg5[%c0_14, %c0_15], %15 {strides = array<i32>} : memref<8x4xf32, #tpu.memory_space<vmem>>, vector<8x4xf32>,
    } else {
    }
    return
  }
  func.func @transform_0(%arg0: i32, %arg1: i32) -> (i32, i32) {
    %c0_i32 = arith.constant 0 : i32
    return %arg0, %arg1 : i32, i32
  }
  func.func @transform_1(%arg0: i32, %arg1: i32) -> (i32, i32) {
    %c0_i32 = arith.constant 0 : i32
    %c0_i32_0 = arith.constant 0 : i32
    return %arg1, %c0_i32 : i32, i32
  }
  func.func @transform_2(%arg0: i32, %arg1: i32) -> (i32, i32) {
    %c0_i32 = arith.constant 0 : i32
    %c0_i32_0 = arith.constant 0 : i32
    %c0_i32_1 = arith.constant 0 : i32
    return %c0_i32, %c0_i32_0 : i32, i32
  }
  func.func @transform_3(%arg0: i32, %arg1: i32) -> (i32, i32) {
    %c0_i32 = arith.constant 0 : i32
    %c0_i32_0 = arith.constant 0 : i32
    return %arg0, %c0_i32 : i32, i32
  }
}

</mosaic_0001>

<bundles_post_ra>
// kernel: _forward_impl.1
= control target key start
LH: loop header
LB: loop body
LE: loop exit
PB: predicated region body
PF: predicated region fallthrough
CT: control target
= control target key end

     0   :  { %vm18_vm0 = vcmask 31744   ;;  %v147_v0 = vmov 0.0|0.0   ;;  %v148_v4 = vmov 0.0   ;;  %vm149_vm1 = vmmov 0   ;;  %s194_s1 = inlined_call_operand.vmem [shape: f32[32,4], index: 1, kind: input, shape index: {}]   ;;  %s195_s0 = inlined_call_operand.vmem [shape: f32[8,32], index: 0, kind: input, shape index: {}]   ;;  %s196_s2 = inlined_call_operand.vmem [shape: f32[1,4], index: 2, kind: input, shape index: {}]   ;;  %s197_s3 = inlined_call_operand.vmem [shape: f32[8,4], index: 3, kind: output, shape index: {}]  }
   0x1   :  { %138 = vmatprep.subr.bf16.mxu0 %v147_v0  ;;  %v22_v1 = vld [vmem:[%s194_s1] sm:$0xff]  ;;  %v23_v2 = vld [vmem:[%s194_s1 + $0x8] sm:$0xff]  ;;  %v24_v3 = vld [vmem:[%s194_s1 + $0x10] sm:$0xff]  ;;  %19 = vst.msk [vmem:[#allocation2] sm:$0xff] %vm18_vm0, %v148_v4  ;;  %135 = vmatprep.mubr.msk.f32.mxu0 %vm149_vm1, %v148_v4  ;;  %vm26_vm2 = vcmask 261120  }
   0x2   :  { %v139_v5 = vpack.c.bf16 %v23_v2, %v22_v1  ;;  %v25_v6 = vld [vmem:[%s194_s1 + $0x18] sm:$0xff]  ;;  %v21_v8 = vld [vmem:[%s195_s0] sm:$0xff] }
   0x3   :  { %v142_v7 = vpack.c.bf16 %v25_v6, %v24_v3  ;;  %v121_v13 = vld [vmem:[%s196_s2] ss:$0 sm:$0xff] }
   0x4   :  { %140 = vmatpush3.bf16.msra.mxu0 %v139_v5 }
   0x5   :  { %141 = vmatprep.subr.bf16.mxu0 %v147_v0 }
   0x8   :  { %143 = vmatpush3.bf16.msra.mxu0 %v142_v7  ;;  %v20_v9 = vld [vmem:[#allocation2] sm:$0xff] }
   0xb   :  { %136 = vmatmul.mubr.msk.f32.vlgmr.msra.gmra.mrb[0].mxu0 %vm26_vm2, %v21_v8 }
  0xde   :  { %v96_v10 = vpop.f32.mrb[0].mxu0 }
  0xdf   :  { %v100_v11 = vadd.f32 %v96_v10, %v20_v9  ;;  %v137_v12 = vpop.f32.mrb[1].mxu0 }
  0xe1   :  { %102 = vst.msk [vmem:[#allocation2] sm:$0xff] %vm18_vm0, %v100_v11 }
  0xe8   :  { %v106_v14 = vld [vmem:[#allocation2] sm:$0xff] }
  0xe9   :  { %v114_v15 = vadd.f32 %v121_v13, %v106_v14 }
  0xeb   :  { %115 = vst.msk [vmem:[%s197_s3] sm:$0xff] %vm18_vm0, %v114_v15 }

</bundles_post_ra>
